<compile_context>
chip_gen: v5e
topology: v5e:2x2
jax: 0.10.0
libtpu: 0.0.40
codegen_flags: <defaults>
</compile_context>

<pallas_src>
import jax
import jax.numpy as jnp
import numpy as np
from jax import lax
from jax.experimental import pallas as pl
from jax.experimental.pallas import tpu as pltpu

KERNEL = 4
STRIDE = 2
PAD = 1
EPS = 1e-5          # nn.InstanceNorm2d default (affine=False, no running stats)
NEG_SLOPE = 0.2     # LeakyReLU slope


def _round_up(a, m):
    return -(-a // m) * m


def _vmem_capacity_bytes():
    """Physical VMEM of the local TPU generation (conservative fallback)."""
    try:
        return int(pltpu.get_tpu_info().vmem_capacity_bytes)
    except Exception:
        return 64 * 1024 * 1024          # v7x-sized fallback: safe on every gen


def _choose_tiling(c_in, c_out, x_len, l_pad, vmem_cap):
    """Pick (C_out tile, K tile) so the kernel working set fits physical VMEM."""
    BF16, F32 = 2, 4
    budget = int(0.70 * vmem_cap)        # headroom for Mosaic internals/temporaries
    k4 = 4 * c_in

    def need(tco, kt):
        return (2 * kt * x_len * BF16        # phase-input block, double-buffered
                + 2 * 4 * tco * kt * BF16    # weight block
                + 2 * tco * l_pad * F32      # resident f32 output/accumulator block
                + 2 * l_pad * F32            # valid-lane mask
                + 2 * kt * l_pad * BF16      # shifted matmul-operand temporaries
                + 2 * tco * l_pad * F32)     # matmul result temporaries

    # C_out tile: multiple of 8, capped at 256 (one 256-wide MXU pass on v6e/v7x).
    tco = min(256, _round_up(c_out, 8))
    kt = _round_up(k4, 8)                # default: contraction axis not tiled
    n_k = 1
    while need(tco, kt) > budget and tco > 8:
        tco = max(8, _round_up(tco // 2, 8))
    if need(tco, kt) > budget and kt > 128:
        # Tile the contraction axis onto the grid.  A tiled (non-full) block
        # dim must be 128-aligned, so pad K up to a multiple of the tile.
        kt = max(128, _round_up(kt // 2, 128))
        while need(tco, kt) > budget and kt > 128:
            kt = max(128, _round_up(kt // 2, 128))
        k4_pad = _round_up(k4, kt)
        n_k = k4_pad // kt
    else:
        k4_pad = kt
    c_out_pad = _round_up(c_out, tco)
    n_co = c_out_pad // tco
    vmem_limit = int(min(max(1.3 * need(tco, kt) + (2 << 20), 32 << 20),
                         0.9 * vmem_cap))
    return tco, c_out_pad, n_co, kt, k4_pad, n_k, vmem_limit


def _prepare_inputs(x, weight, k4_pad, c_out_pad, x_len, hp, wp):
    """Phase-decimate + flatten the padded input; regroup the conv weight.

    Returns
      xflat: (N, k4_pad, x_len) bf16,
             xflat[n, e*C + c, i*wp + j] = x_pad[n, c, 2*i + eh, 2*j + ew]
      w4:    (4, c_out_pad, k4_pad) bf16,
             w4[d, o, e*C + c] = weight[o, c, 2*dh + eh, 2*dw + ew]
             with d <-> (dh, dw), e <-> (eh, ew).
    Total wrapper HBM traffic is ~2x the input (read + write): no im2col
    duplication and no patch tensor.
    """
    n, c, _, _ = x.shape
    c_out = weight.shape[0]

    xb = x.astype(jnp.bfloat16)
    xp = jnp.pad(xb, ((0, 0), (0, 0), (PAD, PAD), (PAD, PAD)))
    phases = []
    for eh in (0, 1):
        for ew in (0, 1):
            phases.append(xp[:, :, eh:eh + 2 * hp:2, ew:ew + 2 * wp:2])  # (N,C,hp,wp)
    xall = jnp.concatenate(phases, axis=1).reshape(n, 4 * c, hp * wp)
    xflat = jnp.pad(xall, ((0, 0), (0, k4_pad - 4 * c), (0, x_len - hp * wp)))

    wb = weight.astype(jnp.bfloat16)                                     # (Co,C,4,4)
    w_groups = []
    for dh in (0, 1):
        for dw in (0, 1):
            taps = [wb[:, :, 2 * dh + eh, 2 * dw + ew]
                    for eh in (0, 1) for ew in (0, 1)]                   # (Co, C) x4
            w_groups.append(jnp.concatenate(taps, axis=1))               # (Co, 4C)
    w4 = jnp.stack(w_groups, axis=0)                                     # (4, Co, 4C)
    w4 = jnp.pad(w4, ((0, 0), (0, c_out_pad - c_out), (0, k4_pad - 4 * c)))
    return xflat, w4


def conv_block_forward(x, weight, bias=None):
    """Fused ConvBlock forward: Conv2d(4, s=2, p=1) -> InstanceNorm2d -> LeakyReLU.

    x:      (N, C_in, H, W) float32, NCHW
    weight: (C_out, C_in, 4, 4)  - PyTorch Conv2d weight layout
    bias:   (C_out,) accepted for API parity but unused: with
            InstanceNorm2d(affine=False) the per-channel bias is cancelled
            exactly by the mean subtraction.  Do NOT keep this elision if the
            norm becomes affine=True or is removed (normalize=False).
    returns (N, C_out, H//2, W//2) float32
    """
    del bias  # mathematically a no-op under InstanceNorm2d(affine=False)

    n, c_in, h, w = x.shape
    c_out = weight.shape[0]
    ho = (h + 2 * PAD - KERNEL) // STRIDE + 1
    wo = (w + 2 * PAD - KERNEL) // STRIDE + 1
    hp, wp = ho + 1, wo + 1                  # phase-tensor spatial extent
    p_true = ho * wo                         # true pixel count per (n, channel)
    l = ho * wp                              # flat output length incl. pad column
    l_pad = _round_up(max(l, 128), 128)      # lane-dense (128-multiple) stores
    x_len = _round_up(l_pad + wp + 1, 128)   # room for the largest shifted view
    offs = (0, 1, wp, wp + 1)                # lane offsets for (dh, dw) in {0,1}^2
    inv_p = 1.0 / float(p_true)

    vmem_cap = _vmem_capacity_bytes()
    tco, c_out_pad, n_co, kt, k4_pad, n_k, vmem_limit = _choose_tiling(
        c_in, c_out, x_len, l_pad, vmem_cap)

    xflat, w4 = _prepare_inputs(x, weight, k4_pad, c_out_pad, x_len, hp, wp)

    # Valid-lane mask: lane f = oh*wp + ow is a real output pixel iff f < l and
    # ow < wo.  Statistics use the TRUE P so padding never skews mean/var.
    f_idx = np.arange(l_pad)
    mask = jnp.asarray(((f_idx < l) & (f_idx % wp < wo)).astype(np.float32)[None, :])

    def kernel(x_ref, w_ref, m_ref, o_ref):
        # x_ref: (1, kt, x_len) bf16      w_ref: (4, tco, kt) bf16
        # m_ref: (1, l_pad) f32           o_ref: (1, tco, l_pad) f32, resident over K
        ki = pl.program_id(2)

        @pl.when(ki == 0)
        def _init():
            o_ref[...] = jnp.zeros_like(o_ref)

        # 4 grouped conv taps: a (dh, dw) output shift of the stride-2 conv
        # commutes with the channel contraction, so it is a static lane offset
        # into the flattened phase tensor.  f32 accumulation on the MXU.
        for d, off in enumerate(offs):
            o_ref[0] += jnp.dot(w_ref[d], x_ref[0, :, off:off + l_pad],
                                preferred_element_type=jnp.float32)

        @pl.when(ki == pl.num_programs(2) - 1)
        def _finalize():
            y = o_ref[0]                                     # (tco, l_pad) f32
            m = m_ref[...]                                   # (1, l_pad)
            ym = y * m
            s = jnp.sum(ym, axis=-1, keepdims=True)          # (tco, 1)
            ss = jnp.sum(ym * y, axis=-1, keepdims=True)
            mean = s * inv_p
            var = jnp.maximum(ss * inv_p - mean * mean, 0.0)  # clamp single-pass var
            rstd = lax.rsqrt(var + EPS)
            yn = (y - mean) * rstd
            o_ref[0] = jnp.where(yn >= 0.0, yn, NEG_SLOPE * yn).astype(o_ref.dtype)

    def build_call(single_buffer):
        def spec(shape, imap, invariant):
            # Single-buffer operands whose block never changes across the grid.
            if single_buffer and invariant and hasattr(pl, "Buffered"):
                try:
                    return pl.BlockSpec(shape, imap, pipeline_mode=pl.Buffered(1))
                except TypeError:
                    pass
            return pl.BlockSpec(shape, imap)

        grid_spec = pltpu.PrefetchScalarGridSpec(
            num_scalar_prefetch=0,
            grid=(n, n_co, n_k),
            in_specs=[
                spec((1, kt, x_len), lambda ni, ci, ki: (ni, ki, 0),
                     invariant=(n == 1 and n_k == 1)),
                spec((4, tco, kt), lambda ni, ci, ki: (0, ci, ki),
                     invariant=(n_co == 1 and n_k == 1)),
                spec((1, l_pad), lambda ni, ci, ki: (0, 0), invariant=True),
            ],
            out_specs=pl.BlockSpec((1, tco, l_pad), lambda ni, ci, ki: (ni, ci, 0)),
        )
        return pl.pallas_call(
            kernel,
            out_shape=jax.ShapeDtypeStruct((n, c_out_pad, l_pad), jnp.float32),
            grid_spec=grid_spec,
            compiler_params=pltpu.CompilerParams(
                dimension_semantics=("parallel", "parallel", "arbitrary"),
                vmem_limit_bytes=vmem_limit),
            cost_estimate=pl.CostEstimate(
                flops=2 * n * 4 * c_out_pad * k4_pad * l_pad,
                transcendentals=n * c_out_pad,
                bytes_accessed=(n * n_co * k4_pad * x_len * 2
                                + n * 4 * c_out_pad * k4_pad * 2
                                + n * c_out_pad * l_pad * 4)),
        )

    try:
        out = build_call(single_buffer=True)(xflat, w4, mask)
    except Exception:
        # pipeline_mode=pl.Buffered(1) unsupported on this build: retry default.
        out = build_call(single_buffer=False)(xflat, w4, mask)

    # Strip channel / lane padding and the per-row pad column (layout ops only).
    out = out[:, :c_out, :l].reshape(n, c_out, ho, wp)[..., :wo]
    return out


def _reference_forward(x, weight, bias):
    """Plain-JAX reference (Conv2d -> InstanceNorm2d -> LeakyReLU), f32."""
    y = lax.conv_general_dilated(
        x, weight, window_strides=(STRIDE, STRIDE),
        padding=((PAD, PAD), (PAD, PAD)),
        dimension_numbers=("NCHW", "OIHW", "NCHW"),
        precision=lax.Precision.HIGHEST)
    y = y + bias.reshape(1, -1, 1, 1)
    mean = jnp.mean(y, axis=(2, 3), keepdims=True)
    var = jnp.mean((y - mean) ** 2, axis=(2, 3), keepdims=True)
    y = (y - mean) / jnp.sqrt(var + EPS)
    return jnp.where(y >= 0, y, NEG_SLOPE * y)


if __name__ == "__main__":
    key = jax.random.PRNGKey(0)
    kx, kw, kb = jax.random.split(key, 3)

    N, C_in, H, W = 2, 4, 16, 16
    C_out = 8

    x = jax.random.normal(kx, (N, C_in, H, W), dtype=jnp.float32)
    weight = 0.1 * jax.random.normal(kw, (C_out, C_in, KERNEL, KERNEL),
                                     dtype=jnp.float32)
    bias = 0.1 * jax.random.normal(kb, (C_out,), dtype=jnp.float32)

    out = conv_block_forward(x, weight, bias)
    jax.block_until_ready(out)
    assert out.shape == (N, C_out, H // 2, W // 2)

    # Tight check vs a reference fed the same bf16-rounded inputs
    # (validates the kernel math itself).
    x_r = x.astype(jnp.bfloat16).astype(jnp.float32)
    w_r = weight.astype(jnp.bfloat16).astype(jnp.float32)
    ref_bf16 = _reference_forward(x_r, w_r, bias)
    assert jnp.allclose(out, ref_bf16, atol=2e-3, rtol=2e-3), \
        float(jnp.max(jnp.abs(out - ref_bf16)))

    # Loose check vs the full-f32 module semantics (bf16 activation feed).
    ref_f32 = _reference_forward(x, weight, bias)
    assert jnp.allclose(out, ref_f32, atol=5e-2, rtol=5e-2), \
        float(jnp.max(jnp.abs(out - ref_f32)))

    print("KERNEL_OK")
</pallas_src>

<mosaic_0001>
module attributes {stable_mosaic.version = 11 : i64} {
  func.func @kernel(%arg0: i32, %arg1: i32, %arg2: i32, %arg3: memref<1x16x256xbf16, #tpu.memory_space<vmem>>, %arg4: memref<4x8x16xbf16, #tpu.memory_space<vmem>>, %arg5: memref<1x128xf32, #tpu.memory_space<vmem>>, %arg6: memref<1x8x128xf32, #tpu.memory_space<vmem>>) attributes {dimension_semantics = [#tpu.dimension_semantics<parallel>, #tpu.dimension_semantics<parallel>, #tpu.dimension_semantics<arbitrary>], iteration_bounds = array<i64: 2, 1, 1>, scalar_prefetch = 0 : i64, scratch_operands = 0 : i64, tpu.core_type = #tpu.core_type<tc>, window_params = [{transform_indices = @transform_0, window_bounds = array<i64: 1, 16, 256>}, {pipeline_mode = #tpu.pipeline_mode<synchronous>, transform_indices = @transform_1, window_bounds = array<i64: 4, 8, 16>}, {pipeline_mode = #tpu.pipeline_mode<synchronous>, transform_indices = @transform_2, window_bounds = array<i64: 1, 128>}, {transform_indices = @transform_3, window_bounds = array<i64: 1, 8, 128>}]} {
    %c0_i32 = arith.constant 0 : i32
    %0 = arith.cmpi eq, %arg2, %c0_i32 : i32
    %1 = arith.extui %0 : i1 to i32
    %c0_i32_0 = arith.constant 0 : i32
    %2 = arith.cmpi ne, %1, %c0_i32_0 : i32
    scf.if %2 {
      %cst_48 = arith.constant 0.000000e+00 : f32
      %50 = vector.broadcast %cst_48 : f32 to vector<1x8x128xf32>
      %c0_49 = arith.constant 0 : index
      %c0_50 = arith.constant 0 : index
      %c0_51 = arith.constant 0 : index
      %51 = vector.load %arg6[%c0_49, %c0_50, %c0_51] : memref<1x8x128xf32, #tpu.memory_space<vmem>>, vector<1x8x128xf32>
      tpu.vector_store %arg6[%c0_49, %c0_50, %c0_51], %50 {strides = array<i32>} : memref<1x8x128xf32, #tpu.memory_space<vmem>>, vector<1x8x128xf32>,
    } else {
    }
    %c0 = arith.constant 0 : index
    %c0_1 = arith.constant 0 : index
    %c0_2 = arith.constant 0 : index
    %3 = vector.load %arg6[%c0, %c0_1, %c0_2] : memref<1x8x128xf32, #tpu.memory_space<vmem>>, vector<1x8x128xf32>
    %4 = vector.shape_cast %3 : vector<1x8x128xf32> to vector<8x128xf32>
    %c0_3 = arith.constant 0 : index
    %c0_4 = arith.constant 0 : index
    %c0_5 = arith.constant 0 : index
    %5 = vector.load %arg4[%c0_3, %c0_4, %c0_5] : memref<4x8x16xbf16, #tpu.memory_space<vmem>>, vector<1x8x16xbf16>
    %6 = vector.shape_cast %5 : vector<1x8x16xbf16> to vector<8x16xbf16>
    %c0_6 = arith.constant 0 : index
    %c0_7 = arith.constant 0 : index
    %c0_8 = arith.constant 0 : index
    %7 = vector.load %arg3[%c0_6, %c0_7, %c0_8] : memref<1x16x256xbf16, #tpu.memory_space<vmem>>, vector<1x16x128xbf16>
    %8 = vector.shape_cast %7 : vector<1x16x128xbf16> to vector<16x128xbf16>
    %cst = arith.constant dense<0.000000e+00> : vector<8x128xf32>
    %9 = tpu.matmul %6, %8, %cst {dimension_numbers = #tpu.dot_dimension_numbers<[1], [0], [0], [1], [0, 0, 1, 1], [], []>} : vector<8x16xbf16>, vector<16x128xbf16>, vector<8x128xf32> -> vector<8x128xf32>
    %10 = arith.addf %4, %9 : vector<8x128xf32>
    %c0_9 = arith.constant 0 : index
    %c0_10 = arith.constant 0 : index
    %c0_11 = arith.constant 0 : index
    %11 = vector.load %arg6[%c0_9, %c0_10, %c0_11] : memref<1x8x128xf32, #tpu.memory_space<vmem>>, vector<1x8x128xf32>
    %12 = vector.shape_cast %11 : vector<1x8x128xf32> to vector<8x128xf32>
    %13 = vector.shape_cast %10 : vector<8x128xf32> to vector<1x8x128xf32>
    tpu.vector_store %arg6[%c0_9, %c0_10, %c0_11], %13 {strides = array<i32>} : memref<1x8x128xf32, #tpu.memory_space<vmem>>, vector<1x8x128xf32>,
    %c0_12 = arith.constant 0 : index
    %c0_13 = arith.constant 0 : index
    %c0_14 = arith.constant 0 : index
    %14 = vector.load %arg6[%c0_12, %c0_13, %c0_14] : memref<1x8x128xf32, #tpu.memory_space<vmem>>, vector<1x8x128xf32>
    %15 = vector.shape_cast %14 : vector<1x8x128xf32> to vector<8x128xf32>
    %c1 = arith.constant 1 : index
    %c0_15 = arith.constant 0 : index
    %c0_16 = arith.constant 0 : index
    %16 = vector.load %arg4[%c1, %c0_15, %c0_16] : memref<4x8x16xbf16, #tpu.memory_space<vmem>>, vector<1x8x16xbf16>
    %17 = vector.shape_cast %16 : vector<1x8x16xbf16> to vector<8x16xbf16>
    %c0_17 = arith.constant 0 : index
    %c0_18 = arith.constant 0 : index
    %c1_19 = arith.constant 1 : index
    %18 = vector.load %arg3[%c0_17, %c0_18, %c1_19] : memref<1x16x256xbf16, #tpu.memory_space<vmem>>, vector<1x16x128xbf16>
    %19 = vector.shape_cast %18 : vector<1x16x128xbf16> to vector<16x128xbf16>
    %cst_20 = arith.constant dense<0.000000e+00> : vector<8x128xf32>
    %20 = tpu.matmul %17, %19, %cst_20 {dimension_numbers = #tpu.dot_dimension_numbers<[1], [0], [0], [1], [0, 0, 1, 1], [], []>} : vector<8x16xbf16>, vector<16x128xbf16>, vector<8x128xf32> -> vector<8x128xf32>
    %21 = arith.addf %15, %20 : vector<8x128xf32>
    %c0_21 = arith.constant 0 : index
    %c0_22 = arith.constant 0 : index
    %c0_23 = arith.constant 0 : index
    %22 = vector.load %arg6[%c0_21, %c0_22, %c0_23] : memref<1x8x128xf32, #tpu.memory_space<vmem>>, vector<1x8x128xf32>
    %23 = vector.shape_cast %22 : vector<1x8x128xf32> to vector<8x128xf32>
    %24 = vector.shape_cast %21 : vector<8x128xf32> to vector<1x8x128xf32>
    tpu.vector_store %arg6[%c0_21, %c0_22, %c0_23], %24 {strides = array<i32>} : memref<1x8x128xf32, #tpu.memory_space<vmem>>, vector<1x8x128xf32>,
    %c0_24 = arith.constant 0 : index
    %c0_25 = arith.constant 0 : index
    %c0_26 = arith.constant 0 : index
    %25 = vector.load %arg6[%c0_24, %c0_25, %c0_26] : memref<1x8x128xf32, #tpu.memory_space<vmem>>, vector<1x8x128xf32>
    %26 = vector.shape_cast %25 : vector<1x8x128xf32> to vector<8x128xf32>
    %c2 = arith.constant 2 : index
    %c0_27 = arith.constant 0 : index
    %c0_28 = arith.constant 0 : index
    %27 = vector.load %arg4[%c2, %c0_27, %c0_28] : memref<4x8x16xbf16, #tpu.memory_space<vmem>>, vector<1x8x16xbf16>
    %28 = vector.shape_cast %27 : vector<1x8x16xbf16> to vector<8x16xbf16>
    %c0_29 = arith.constant 0 : index
    %c0_30 = arith.constant 0 : index
    %c9 = arith.constant 9 : index
    %29 = vector.load %arg3[%c0_29, %c0_30, %c9] : memref<1x16x256xbf16, #tpu.memory_space<vmem>>, vector<1x16x128xbf16>
    %30 = vector.shape_cast %29 : vector<1x16x128xbf16> to vector<16x128xbf16>
    %cst_31 = arith.constant dense<0.000000e+00> : vector<8x128xf32>
    %31 = tpu.matmul %28, %30, %cst_31 {dimension_numbers = #tpu.dot_dimension_numbers<[1], [0], [0], [1], [0, 0, 1, 1], [], []>} : vector<8x16xbf16>, vector<16x128xbf16>, vector<8x128xf32> -> vector<8x128xf32>
    %32 = arith.addf %26, %31 : vector<8x128xf32>
    %c0_32 = arith.constant 0 : index
    %c0_33 = arith.constant 0 : index
    %c0_34 = arith.constant 0 : index
    %33 = vector.load %arg6[%c0_32, %c0_33, %c0_34] : memref<1x8x128xf32, #tpu.memory_space<vmem>>, vector<1x8x128xf32>
    %34 = vector.shape_cast %33 : vector<1x8x128xf32> to vector<8x128xf32>
    %35 = vector.shape_cast %32 : vector<8x128xf32> to vector<1x8x128xf32>
    tpu.vector_store %arg6[%c0_32, %c0_33, %c0_34], %35 {strides = array<i32>} : memref<1x8x128xf32, #tpu.memory_space<vmem>>, vector<1x8x128xf32>,
    %c0_35 = arith.constant 0 : index
    %c0_36 = arith.constant 0 : index
    %c0_37 = arith.constant 0 : index
    %36 = vector.load %arg6[%c0_35, %c0_36, %c0_37] : memref<1x8x128xf32, #tpu.memory_space<vmem>>, vector<1x8x128xf32>
    %37 = vector.shape_cast %36 : vector<1x8x128xf32> to vector<8x128xf32>
    %c3 = arith.constant 3 : index
    %c0_38 = arith.constant 0 : index
    %c0_39 = arith.constant 0 : index
    %38 = vector.load %arg4[%c3, %c0_38, %c0_39] : memref<4x8x16xbf16, #tpu.memory_space<vmem>>, vector<1x8x16xbf16>
    %39 = vector.shape_cast %38 : vector<1x8x16xbf16> to vector<8x16xbf16>
    %c0_40 = arith.constant 0 : index
    %c0_41 = arith.constant 0 : index
    %c10 = arith.constant 10 : index
    %40 = vector.load %arg3[%c0_40, %c0_41, %c10] : memref<1x16x256xbf16, #tpu.memory_space<vmem>>, vector<1x16x128xbf16>
    %41 = vector.shape_cast %40 : vector<1x16x128xbf16> to vector<16x128xbf16>
    %cst_42 = arith.constant dense<0.000000e+00> : vector<8x128xf32>
    %42 = tpu.matmul %39, %41, %cst_42 {dimension_numbers = #tpu.dot_dimension_numbers<[1], [0], [0], [1], [0, 0, 1, 1], [], []>} : vector<8x16xbf16>, vector<16x128xbf16>, vector<8x128xf32> -> vector<8x128xf32>
    %43 = arith.addf %37, %42 : vector<8x128xf32>
    %c0_43 = arith.constant 0 : index
    %c0_44 = arith.constant 0 : index
    %c0_45 = arith.constant 0 : index
    %44 = vector.load %arg6[%c0_43, %c0_44, %c0_45] : memref<1x8x128xf32, #tpu.memory_space<vmem>>, vector<1x8x128xf32>
    %45 = vector.shape_cast %44 : vector<1x8x128xf32> to vector<8x128xf32>
    %46 = vector.shape_cast %43 : vector<8x128xf32> to vector<1x8x128xf32>
    tpu.vector_store %arg6[%c0_43, %c0_44, %c0_45], %46 {strides = array<i32>} : memref<1x8x128xf32, #tpu.memory_space<vmem>>, vector<1x8x128xf32>,
    %c0_i32_46 = arith.constant 0 : i32
    %47 = arith.cmpi eq, %arg2, %c0_i32_46 : i32
    %48 = arith.extui %47 : i1 to i32
    %c0_i32_47 = arith.constant 0 : i32
    %49 = arith.cmpi ne, %48, %c0_i32_47 : i32
    scf.if %49 {
      %c0_48 = arith.constant 0 : index
      %c0_49 = arith.constant 0 : index
      %c0_50 = arith.constant 0 : index
      %50 = vector.load %arg6[%c0_48, %c0_49, %c0_50] : memref<1x8x128xf32, #tpu.memory_space<vmem>>, vector<1x8x128xf32>
      %51 = vector.shape_cast %50 : vector<1x8x128xf32> to vector<8x128xf32>
      %c0_51 = arith.constant 0 : index
      %c0_52 = arith.constant 0 : index
      %52 = vector.load %arg5[%c0_51, %c0_52] : memref<1x128xf32, #tpu.memory_space<vmem>>, vector<1x128xf32>
      %53 = vector.broadcast %52 : vector<1x128xf32> to vector<8x128xf32>
      %54 = arith.mulf %51, %53 : vector<8x128xf32>
      %cst_53 = arith.constant dense<0.000000e+00> : vector<8xf32>
      %55 = vector.multi_reduction <add>, %54, %cst_53 [1] : vector<8x128xf32> to vector<8xf32>
      %56 = vector.shape_cast %55 : vector<8xf32> to vector<8x1xf32>
      %57 = arith.mulf %54, %51 : vector<8x128xf32>
      %cst_54 = arith.constant dense<0.000000e+00> : vector<8xf32>
      %58 = vector.multi_reduction <add>, %57, %cst_54 [1] : vector<8x128xf32> to vector<8xf32>
      %59 = vector.shape_cast %58 : vector<8xf32> to vector<8x1xf32>
      %cst_55 = arith.constant 1.562500e-02 : f32
      %60 = vector.broadcast %cst_55 : f32 to vector<8x1xf32>
      %61 = arith.mulf %56, %60 : vector<8x1xf32>
      %cst_56 = arith.constant 1.562500e-02 : f32
      %62 = vector.broadcast %cst_56 : f32 to vector<8x1xf32>
      %63 = arith.mulf %59, %62 : vector<8x1xf32>
      %64 = arith.mulf %61, %61 : vector<8x1xf32>
      %65 = arith.subf %63, %64 : vector<8x1xf32>
      %cst_57 = arith.constant 0.000000e+00 : f32
      %66 = vector.broadcast %cst_57 : f32 to vector<8x1xf32>
      %67 = arith.maximumf %65, %66 : vector<8x1xf32>
      %cst_58 = arith.constant 9.99999974E-6 : f32
      %68 = vector.broadcast %cst_58 : f32 to vector<8x1xf32>
      %69 = arith.addf %67, %68 : vector<8x1xf32>
      %70 = math.rsqrt %69 : vector<8x1xf32>
      %71 = vector.broadcast %61 : vector<8x1xf32> to vector<8x128xf32>
      %72 = arith.subf %51, %71 : vector<8x128xf32>
      %73 = vector.broadcast %70 : vector<8x1xf32> to vector<8x128xf32>
      %74 = arith.mulf %72, %73 : vector<8x128xf32>
      %cst_59 = arith.constant 0.000000e+00 : f32
      %75 = vector.broadcast %cst_59 : f32 to vector<8x128xf32>
      %76 = arith.cmpf oge, %74, %75 : vector<8x128xf32>
      %cst_60 = arith.constant 2.000000e-01 : f32
      %77 = vector.broadcast %cst_60 : f32 to vector<8x128xf32>
      %78 = arith.mulf %77, %74 : vector<8x128xf32>
      %79 = arith.select %76, %74, %78 : vector<8x128xi1>, vector<8x128xf32>
      %c0_61 = arith.constant 0 : index
      %c0_62 = arith.constant 0 : index
      %c0_63 = arith.constant 0 : index
      %80 = vector.load %arg6[%c0_61, %c0_62, %c0_63] : memref<1x8x128xf32, #tpu.memory_space<vmem>>, vector<1x8x128xf32>
      %81 = vector.shape_cast %80 : vector<1x8x128xf32> to vector<8x128xf32>
      %82 = vector.shape_cast %79 : vector<8x128xf32> to vector<1x8x128xf32>
      tpu.vector_store %arg6[%c0_61, %c0_62, %c0_63], %82 {strides = array<i32>} : memref<1x8x128xf32, #tpu.memory_space<vmem>>, vector<1x8x128xf32>,
    } else {
    }
    return
  }
  func.func @transform_0(%arg0: i32, %arg1: i32, %arg2: i32) -> (i32, i32, i32) {
    %c0_i32 = arith.constant 0 : i32
    %c0_i32_0 = arith.constant 0 : i32
    return %arg0, %arg2, %c0_i32 : i32, i32, i32
  }
  func.func @transform_1(%arg0: i32, %arg1: i32, %arg2: i32) -> (i32, i32, i32) {
    %c0_i32 = arith.constant 0 : i32
    %c0_i32_0 = arith.constant 0 : i32
    return %c0_i32, %arg1, %arg2 : i32, i32, i32
  }
  func.func @transform_2(%arg0: i32, %arg1: i32, %arg2: i32) -> (i32, i32) {
    %c0_i32 = arith.constant 0 : i32
    %c0_i32_0 = arith.constant 0 : i32
    %c0_i32_1 = arith.constant 0 : i32
    return %c0_i32, %c0_i32_0 : i32, i32
  }
  func.func @transform_3(%arg0: i32, %arg1: i32, %arg2: i32) -> (i32, i32, i32) {
    %c0_i32 = arith.constant 0 : i32
    %c0_i32_0 = arith.constant 0 : i32
    return %arg0, %arg1, %c0_i32 : i32, i32, i32
  }
}

module attributes {stable_mosaic.version = 11 : i64} {
  func.func @kernel(%arg0: i32, %arg1: i32, %arg2: i32, %arg3: memref<1x16x256xbf16, #tpu.memory_space<vmem>>, %arg4: memref<4x8x16xbf16, #tpu.memory_space<vmem>>, %arg5: memref<1x128xf32, #tpu.memory_space<vmem>>, %arg6: memref<1x8x128xf32, #tpu.memory_space<vmem>>) attributes {dimension_semantics = [#tpu.dimension_semantics<parallel>, #tpu.dimension_semantics<parallel>, #tpu.dimension_semantics<arbitrary>], iteration_bounds = array<i64: 2, 1, 1>, scalar_prefetch = 0 : i64, scratch_operands = 0 : i64, tpu.core_type = #tpu.core_type<tc>, window_params = [{transform_indices = @transform_0, window_bounds = array<i64: 1, 16, 256>}, {transform_indices = @transform_1, window_bounds = array<i64: 4, 8, 16>}, {pipeline_mode = #tpu.pipeline_mode<synchronous>, transform_indices = @transform_2, window_bounds = array<i64: 1, 128>}, {transform_indices = @transform_3, window_bounds = array<i64: 1, 8, 128>}]} {
    %c0_i32 = arith.constant 0 : i32
    %0 = arith.cmpi eq, %arg2, %c0_i32 : i32
    %1 = arith.extui %0 : i1 to i32
    %c0_i32_0 = arith.constant 0 : i32
    %2 = arith.cmpi ne, %1, %c0_i32_0 : i32
    scf.if %2 {
      %cst_48 = arith.constant 0.000000e+00 : f32
      %50 = vector.broadcast %cst_48 : f32 to vector<1x8x128xf32>
      %c0_49 = arith.constant 0 : index
      %c0_50 = arith.constant 0 : index
      %c0_51 = arith.constant 0 : index
      %51 = vector.load %arg6[%c0_49, %c0_50, %c0_51] : memref<1x8x128xf32, #tpu.memory_space<vmem>>, vector<1x8x128xf32>
      tpu.vector_store %arg6[%c0_49, %c0_50, %c0_51], %50 {strides = array<i32>} : memref<1x8x128xf32, #tpu.memory_space<vmem>>, vector<1x8x128xf32>,
    } else {
    }
    %c0 = arith.constant 0 : index
    %c0_1 = arith.constant 0 : index
    %c0_2 = arith.constant 0 : index
    %3 = vector.load %arg6[%c0, %c0_1, %c0_2] : memref<1x8x128xf32, #tpu.memory_space<vmem>>, vector<1x8x128xf32>
    %4 = vector.shape_cast %3 : vector<1x8x128xf32> to vector<8x128xf32>
    %c0_3 = arith.constant 0 : index
    %c0_4 = arith.constant 0 : index
    %c0_5 = arith.constant 0 : index
    %5 = vector.load %arg4[%c0_3, %c0_4, %c0_5] : memref<4x8x16xbf16, #tpu.memory_space<vmem>>, vector<1x8x16xbf16>
    %6 = vector.shape_cast %5 : vector<1x8x16xbf16> to vector<8x16xbf16>
    %c0_6 = arith.constant 0 : index
    %c0_7 = arith.constant 0 : index
    %c0_8 = arith.constant 0 : index
    %7 = vector.load %arg3[%c0_6, %c0_7, %c0_8] : memref<1x16x256xbf16, #tpu.memory_space<vmem>>, vector<1x16x128xbf16>
    %8 = vector.shape_cast %7 : vector<1x16x128xbf16> to vector<16x128xbf16>
    %cst = arith.constant dense<0.000000e+00> : vector<8x128xf32>
    %9 = tpu.matmul %6, %8, %cst {dimension_numbers = #tpu.dot_dimension_numbers<[1], [0], [0], [1], [0, 0, 1, 1], [], []>} : vector<8x16xbf16>, vector<16x128xbf16>, vector<8x128xf32> -> vector<8x128xf32>
    %10 = arith.addf %4, %9 : vector<8x128xf32>
    %c0_9 = arith.constant 0 : index
    %c0_10 = arith.constant 0 : index
    %c0_11 = arith.constant 0 : index
    %11 = vector.load %arg6[%c0_9, %c0_10, %c0_11] : memref<1x8x128xf32, #tpu.memory_space<vmem>>, vector<1x8x128xf32>
    %12 = vector.shape_cast %11 : vector<1x8x128xf32> to vector<8x128xf32>
    %13 = vector.shape_cast %10 : vector<8x128xf32> to vector<1x8x128xf32>
    tpu.vector_store %arg6[%c0_9, %c0_10, %c0_11], %13 {strides = array<i32>} : memref<1x8x128xf32, #tpu.memory_space<vmem>>, vector<1x8x128xf32>,
    %c0_12 = arith.constant 0 : index
    %c0_13 = arith.constant 0 : index
    %c0_14 = arith.constant 0 : index
    %14 = vector.load %arg6[%c0_12, %c0_13, %c0_14] : memref<1x8x128xf32, #tpu.memory_space<vmem>>, vector<1x8x128xf32>
    %15 = vector.shape_cast %14 : vector<1x8x128xf32> to vector<8x128xf32>
    %c1 = arith.constant 1 : index
    %c0_15 = arith.constant 0 : index
    %c0_16 = arith.constant 0 : index
    %16 = vector.load %arg4[%c1, %c0_15, %c0_16] : memref<4x8x16xbf16, #tpu.memory_space<vmem>>, vector<1x8x16xbf16>
    %17 = vector.shape_cast %16 : vector<1x8x16xbf16> to vector<8x16xbf16>
    %c0_17 = arith.constant 0 : index
    %c0_18 = arith.constant 0 : index
    %c1_19 = arith.constant 1 : index
    %18 = vector.load %arg3[%c0_17, %c0_18, %c1_19] : memref<1x16x256xbf16, #tpu.memory_space<vmem>>, vector<1x16x128xbf16>
    %19 = vector.shape_cast %18 : vector<1x16x128xbf16> to vector<16x128xbf16>
    %cst_20 = arith.constant dense<0.000000e+00> : vector<8x128xf32>
    %20 = tpu.matmul %17, %19, %cst_20 {dimension_numbers = #tpu.dot_dimension_numbers<[1], [0], [0], [1], [0, 0, 1, 1], [], []>} : vector<8x16xbf16>, vector<16x128xbf16>, vector<8x128xf32> -> vector<8x128xf32>
    %21 = arith.addf %15, %20 : vector<8x128xf32>
    %c0_21 = arith.constant 0 : index
    %c0_22 = arith.constant 0 : index
    %c0_23 = arith.constant 0 : index
    %22 = vector.load %arg6[%c0_21, %c0_22, %c0_23] : memref<1x8x128xf32, #tpu.memory_space<vmem>>, vector<1x8x128xf32>
    %23 = vector.shape_cast %22 : vector<1x8x128xf32> to vector<8x128xf32>
    %24 = vector.shape_cast %21 : vector<8x128xf32> to vector<1x8x128xf32>
    tpu.vector_store %arg6[%c0_21, %c0_22, %c0_23], %24 {strides = array<i32>} : memref<1x8x128xf32, #tpu.memory_space<vmem>>, vector<1x8x128xf32>,
    %c0_24 = arith.constant 0 : index
    %c0_25 = arith.constant 0 : index
    %c0_26 = arith.constant 0 : index
    %25 = vector.load %arg6[%c0_24, %c0_25, %c0_26] : memref<1x8x128xf32, #tpu.memory_space<vmem>>, vector<1x8x128xf32>
    %26 = vector.shape_cast %25 : vector<1x8x128xf32> to vector<8x128xf32>
    %c2 = arith.constant 2 : index
    %c0_27 = arith.constant 0 : index
    %c0_28 = arith.constant 0 : index
    %27 = vector.load %arg4[%c2, %c0_27, %c0_28] : memref<4x8x16xbf16, #tpu.memory_space<vmem>>, vector<1x8x16xbf16>
    %28 = vector.shape_cast %27 : vector<1x8x16xbf16> to vector<8x16xbf16>
    %c0_29 = arith.constant 0 : index
    %c0_30 = arith.constant 0 : index
    %c9 = arith.constant 9 : index
    %29 = vector.load %arg3[%c0_29, %c0_30, %c9] : memref<1x16x256xbf16, #tpu.memory_space<vmem>>, vector<1x16x128xbf16>
    %30 = vector.shape_cast %29 : vector<1x16x128xbf16> to vector<16x128xbf16>
    %cst_31 = arith.constant dense<0.000000e+00> : vector<8x128xf32>
    %31 = tpu.matmul %28, %30, %cst_31 {dimension_numbers = #tpu.dot_dimension_numbers<[1], [0], [0], [1], [0, 0, 1, 1], [], []>} : vector<8x16xbf16>, vector<16x128xbf16>, vector<8x128xf32> -> vector<8x128xf32>
    %32 = arith.addf %26, %31 : vector<8x128xf32>
    %c0_32 = arith.constant 0 : index
    %c0_33 = arith.constant 0 : index
    %c0_34 = arith.constant 0 : index
    %33 = vector.load %arg6[%c0_32, %c0_33, %c0_34] : memref<1x8x128xf32, #tpu.memory_space<vmem>>, vector<1x8x128xf32>
    %34 = vector.shape_cast %33 : vector<1x8x128xf32> to vector<8x128xf32>
    %35 = vector.shape_cast %32 : vector<8x128xf32> to vector<1x8x128xf32>
    tpu.vector_store %arg6[%c0_32, %c0_33, %c0_34], %35 {strides = array<i32>} : memref<1x8x128xf32, #tpu.memory_space<vmem>>, vector<1x8x128xf32>,
    %c0_35 = arith.constant 0 : index
    %c0_36 = arith.constant 0 : index
    %c0_37 = arith.constant 0 : index
    %36 = vector.load %arg6[%c0_35, %c0_36, %c0_37] : memref<1x8x128xf32, #tpu.memory_space<vmem>>, vector<1x8x128xf32>
    %37 = vector.shape_cast %36 : vector<1x8x128xf32> to vector<8x128xf32>
    %c3 = arith.constant 3 : index
    %c0_38 = arith.constant 0 : index
    %c0_39 = arith.constant 0 : index
    %38 = vector.load %arg4[%c3, %c0_38, %c0_39] : memref<4x8x16xbf16, #tpu.memory_space<vmem>>, vector<1x8x16xbf16>
    %39 = vector.shape_cast %38 : vector<1x8x16xbf16> to vector<8x16xbf16>
    %c0_40 = arith.constant 0 : index
    %c0_41 = arith.constant 0 : index
    %c10 = arith.constant 10 : index
    %40 = vector.load %arg3[%c0_40, %c0_41, %c10] : memref<1x16x256xbf16, #tpu.memory_space<vmem>>, vector<1x16x128xbf16>
    %41 = vector.shape_cast %40 : vector<1x16x128xbf16> to vector<16x128xbf16>
    %cst_42 = arith.constant dense<0.000000e+00> : vector<8x128xf32>
    %42 = tpu.matmul %39, %41, %cst_42 {dimension_numbers = #tpu.dot_dimension_numbers<[1], [0], [0], [1], [0, 0, 1, 1], [], []>} : vector<8x16xbf16>, vector<16x128xbf16>, vector<8x128xf32> -> vector<8x128xf32>
    %43 = arith.addf %37, %42 : vector<8x128xf32>
    %c0_43 = arith.constant 0 : index
    %c0_44 = arith.constant 0 : index
    %c0_45 = arith.constant 0 : index
    %44 = vector.load %arg6[%c0_43, %c0_44, %c0_45] : memref<1x8x128xf32, #tpu.memory_space<vmem>>, vector<1x8x128xf32>
    %45 = vector.shape_cast %44 : vector<1x8x128xf32> to vector<8x128xf32>
    %46 = vector.shape_cast %43 : vector<8x128xf32> to vector<1x8x128xf32>
    tpu.vector_store %arg6[%c0_43, %c0_44, %c0_45], %46 {strides = array<i32>} : memref<1x8x128xf32, #tpu.memory_space<vmem>>, vector<1x8x128xf32>,
    %c0_i32_46 = arith.constant 0 : i32
    %47 = arith.cmpi eq, %arg2, %c0_i32_46 : i32
    %48 = arith.extui %47 : i1 to i32
    %c0_i32_47 = arith.constant 0 : i32
    %49 = arith.cmpi ne, %48, %c0_i32_47 : i32
    scf.if %49 {
      %c0_48 = arith.constant 0 : index
      %c0_49 = arith.constant 0 : index
      %c0_50 = arith.constant 0 : index
      %50 = vector.load %arg6[%c0_48, %c0_49, %c0_50] : memref<1x8x128xf32, #tpu.memory_space<vmem>>, vector<1x8x128xf32>
      %51 = vector.shape_cast %50 : vector<1x8x128xf32> to vector<8x128xf32>
      %c0_51 = arith.constant 0 : index
      %c0_52 = arith.constant 0 : index
      %52 = vector.load %arg5[%c0_51, %c0_52] : memref<1x128xf32, #tpu.memory_space<vmem>>, vector<1x128xf32>
      %53 = vector.broadcast %52 : vector<1x128xf32> to vector<8x128xf32>
      %54 = arith.mulf %51, %53 : vector<8x128xf32>
      %cst_53 = arith.constant dense<0.000000e+00> : vector<8xf32>
      %55 = vector.multi_reduction <add>, %54, %cst_53 [1] : vector<8x128xf32> to vector<8xf32>
      %56 = vector.shape_cast %55 : vector<8xf32> to vector<8x1xf32>
      %57 = arith.mulf %54, %51 : vector<8x128xf32>
      %cst_54 = arith.constant dense<0.000000e+00> : vector<8xf32>
      %58 = vector.multi_reduction <add>, %57, %cst_54 [1] : vector<8x128xf32> to vector<8xf32>
      %59 = vector.shape_cast %58 : vector<8xf32> to vector<8x1xf32>
      %cst_55 = arith.constant 1.562500e-02 : f32
      %60 = vector.broadcast %cst_55 : f32 to vector<8x1xf32>
      %61 = arith.mulf %56, %60 : vector<8x1xf32>
      %cst_56 = arith.constant 1.562500e-02 : f32
      %62 = vector.broadcast %cst_56 : f32 to vector<8x1xf32>
      %63 = arith.mulf %59, %62 : vector<8x1xf32>
      %64 = arith.mulf %61, %61 : vector<8x1xf32>
      %65 = arith.subf %63, %64 : vector<8x1xf32>
      %cst_57 = arith.constant 0.000000e+00 : f32
      %66 = vector.broadcast %cst_57 : f32 to vector<8x1xf32>
      %67 = arith.maximumf %65, %66 : vector<8x1xf32>
      %cst_58 = arith.constant 9.99999974E-6 : f32
      %68 = vector.broadcast %cst_58 : f32 to vector<8x1xf32>
      %69 = arith.addf %67, %68 : vector<8x1xf32>
      %70 = math.rsqrt %69 : vector<8x1xf32>
      %71 = vector.broadcast %61 : vector<8x1xf32> to vector<8x128xf32>
      %72 = arith.subf %51, %71 : vector<8x128xf32>
      %73 = vector.broadcast %70 : vector<8x1xf32> to vector<8x128xf32>
      %74 = arith.mulf %72, %73 : vector<8x128xf32>
      %cst_59 = arith.constant 0.000000e+00 : f32
      %75 = vector.broadcast %cst_59 : f32 to vector<8x128xf32>
      %76 = arith.cmpf oge, %74, %75 : vector<8x128xf32>
      %cst_60 = arith.constant 2.000000e-01 : f32
      %77 = vector.broadcast %cst_60 : f32 to vector<8x128xf32>
      %78 = arith.mulf %77, %74 : vector<8x128xf32>
      %79 = arith.select %76, %74, %78 : vector<8x128xi1>, vector<8x128xf32>
      %c0_61 = arith.constant 0 : index
      %c0_62 = arith.constant 0 : index
      %c0_63 = arith.constant 0 : index
      %80 = vector.load %arg6[%c0_61, %c0_62, %c0_63] : memref<1x8x128xf32, #tpu.memory_space<vmem>>, vector<1x8x128xf32>
      %81 = vector.shape_cast %80 : vector<1x8x128xf32> to vector<8x128xf32>
      %82 = vector.shape_cast %79 : vector<8x128xf32> to vector<1x8x128xf32>
      tpu.vector_store %arg6[%c0_61, %c0_62, %c0_63], %82 {strides = array<i32>} : memref<1x8x128xf32, #tpu.memory_space<vmem>>, vector<1x8x128xf32>,
    } else {
    }
    return
  }
  func.func @transform_0(%arg0: i32, %arg1: i32, %arg2: i32) -> (i32, i32, i32) {
    %c0_i32 = arith.constant 0 : i32
    %c0_i32_0 = arith.constant 0 : i32
    return %arg0, %arg2, %c0_i32 : i32, i32, i32
  }
  func.func @transform_1(%arg0: i32, %arg1: i32, %arg2: i32) -> (i32, i32, i32) {
    %c0_i32 = arith.constant 0 : i32
    %c0_i32_0 = arith.constant 0 : i32
    return %c0_i32, %arg1, %arg2 : i32, i32, i32
  }
  func.func @transform_2(%arg0: i32, %arg1: i32, %arg2: i32) -> (i32, i32) {
    %c0_i32 = arith.constant 0 : i32
    %c0_i32_0 = arith.constant 0 : i32
    %c0_i32_1 = arith.constant 0 : i32
    return %c0_i32, %c0_i32_0 : i32, i32
  }
  func.func @transform_3(%arg0: i32, %arg1: i32, %arg2: i32) -> (i32, i32, i32) {
    %c0_i32 = arith.constant 0 : i32
    %c0_i32_0 = arith.constant 0 : i32
    return %arg0, %arg1, %c0_i32 : i32, i32, i32
  }
}

</mosaic_0001>

<bundles_post_ra>
// kernel: tpu_custom_call.1
= control target key start
LH: loop header
LB: loop body
LE: loop exit
PB: predicated region body
PF: predicated region fallthrough
CT: control target
= control target key end

     0   :  { %s1018_s0 = inlined_call_operand.hbm [shape: bf16[2,16,256], index: 0, kind: input, shape index: {}]   ;;  %s1019_s1 = inlined_call_operand.hbm [shape: bf16[4,8,16], index: 1, kind: input, shape index: {}]   ;;  %s1020_s2 = inlined_call_operand.vmem [shape: f32[1,128], index: 2, kind: input, shape index: {}]   ;;  %s1021_s3 = inlined_call_operand.hbm [shape: f32[2,8,128], index: 3, kind: output, shape index: {}]  }
   0x1   :  { %1022 = sst [smem:[#allocation11_spill]] %s1019_s1 }
   0x2   :  { %8 = vsyncpa [#allocation3], 0 }
   0x3   :  { %10 = vsyncpa [#allocation3 + $0x1], 0 }
   0x4   :  { %11 = vsyncpa [#allocation6], 0 }
   0x5   :  { %12 = vsyncpa [#allocation4], 0 }
   0x6   :  { %14 = vsyncpa [#allocation4 + $0x1], 0  ;;  %s861_s12 = smov 0   ;;  %s863_s13 = smov 0  }
   0x7   :  { %s865_s14 = smov 0   ;;  %s867_s15 = smov 0  }
   0x8   :  { %s869_s16 = smov 0   ;;  %s871_s17 = smov 0  }
   0x9 LB: > { %s545_s18 = sadd.s32 4294967295, %s831_s17   ;;  %s546_s19 = sadd.s32 4294967294, %s831_s17   ;;  %s831_s17 = sphi %s871_s17, %s20_s17   ;;  %s827_s16 = sphi %s869_s16, %s1035_s16   ;;  %s823_s15 = sphi %s867_s15, %s1034_s15   ;;  %s819_s14 = sphi %s865_s14, %s1033_s14   ;;  %s815_s13 = sphi %s863_s13, %s1032_s13   ;;  %s811_s12 = sphi %s861_s12, %s1031_s12  }
   0xa   : > { %p61_p0 = scmp.ne.s32.totalorder %s815_s13, %s811_s12  ;;  %p895_p1 = scmp.eq.s32.totalorder %s545_s18, 0 }
   0xb   : > { %p899_p2 = scmp.eq.s32.totalorder %s545_s18, 1  ;;  %p142_p3 = scmp.eq.s32.totalorder %s546_s19, 1 }
   0xc   : > { %p905_p4 = por %p895_p1, %p61_p0  ;;  %p547_p5 = scmp.ge.s32.totalorder %s831_s17, 1 }
   0xd   : > { %p910_p6 = por %p142_p3, %p61_p0  ;;  %p149_p7 = scmp.lt.s32.totalorder %s831_s17, 3 }
   0xe   : > { %s1027_s1 = sld [smem:[#allocation11_spill]]  ;;  %s833_s28 = smov [#allocation5]  }
   0xf   : > { %p918_p8 = pnand %p547_p5, %p149_p7  ;;  %s165_s29 = sshll.u32 %s833_s28, 4  ;;  %s166_s29 = int_to_ptr.vmem [resolvable:$true] %s165_s29 }
  0x10   : > { %p549_p11 = scmp.ge.s32.totalorder %s831_s17, 2  ;;  %s834_s30 = smov 64  }
  0x11   : > { %p609_p9 = pneg %p918_p8  ;;  %s835_s4 = smov 4  }
  0x12   : > { %s39_s5 = sadd.s32 1, %s827_s16  ;;  %s48_s6 = sadd.s32 1, %s819_s14 }
  0x13   : > { %p610_p10 = pnand %p609_p9, %p895_p1  ;;  %p41_p12 = scmp.ge.s32.totalorder %s39_s5, 2 }
  0x14   : > { %s163_s26 = sshll.u32 %s1027_s1, 4  ;;  %p55_p13 = scmp.ne.s32.totalorder %s819_s14, %s815_s13  ;;  %s164_s26 = int_to_ptr.hbm [resolvable:$true] %s163_s26 }
  0x15   : > { %612 = dma.hbm_to_vmem [thread:$0]  (!%p610_p10), %s164_s26, 256, %s166_s29, [#allocation6], %s834_s30, %s834_s30, %s835_s4  }
  0x16   : > { %p56_p0 = scmp.eq.s32.totalorder %s831_s17, 0  ;;  %s1037_s5 = smov (%p41_p12, %s39_s5), 0 }
  0x17   : > { %p940_p5 = por %p899_p2, %p55_p13  ;;  %s43_s9 = ssub.s32 %s827_s16, %s1037_s5 }
  0x18   : > { %p934_p3 = por %p56_p0, %p55_p13  ;;  %p622_p7 = scmp.lt.s32.totalorder %s831_s17, 2 }
  0x19   : > { %p46_p9 = scmp.eq.s32.totalorder %s43_s9, 0  ;;  %s182_s10 = sand.u32 1, %s819_s14  }
  0x1a   : > { %s550_s11 = sshll.u32 %s182_s10, 4  ;;  %s593_s19 = sshll.u32 %s827_s16, 4 }
  0x1b   : > { %s949_s18 = scalar_select %p46_p9, %s819_s14, %s48_s6  }
  0x1c   : > { %s194_s26 = scalar_lea.hbm %s1018_s0, %s593_s19  ;;  %s186_s28 = scalar_lea.vmem [#allocation2], %s550_s11 }
  0x1d   : > { %s197_s29 = sshll.u32 %s186_s28, 4  ;;  %s195_s21 = sshll.u32 %s194_s26, 4  ;;  %s198_s29 = int_to_ptr.vmem [resolvable:$true] %s197_s29  ;;  %s196_s21 = int_to_ptr.hbm [resolvable:$true] %s195_s21 }
  0x1e   : > { %p614_p2 = pnand %p622_p7, %p934_p3  ;;  %s183_s30 = scalar_lea.sflag [#allocation3], %s182_s10 }
  0x1f   : > { %s836_s4 = smov 128   ;;  %s837_s1 = smov 8  }
  0x20   : > { %616 = dma.hbm_to_vmem [thread:$0]  (!%p614_p2), %s196_s21, 256, %s198_s29, %s183_s30, %s836_s4, %s836_s4, %s837_s1  }
  0x21   : > { %209 = sbr.rel (%p918_p8) target bundleno = 461 (0x1cd), region = 32  ;;  %s960_s6 = sand.u32 (!%p918_p8), 1, %s815_s13  }
  0x22   : > { %s554_s9 = sshll.u32 (!%p918_p8), %s960_s6, 4  ;;  %s212_s11 = scalar_lea.sflag (!%p918_p8), [#allocation3], %s960_s6 }
  0x23   : > { %s215_s19 = scalar_lea.vmem (!%p918_p8), [#allocation2], %s554_s9 }
  0x26   : > { %798 = dma.done.wait (%p905_p4), %s212_s11, 256  }
  0x27   : > { %800 = vsyncadd (%p905_p4), %s212_s11, 4294967040 }
  0x28   : > { %802 = dma.done.wait (%p895_p1), [#allocation6], 256  }
  0x29   : > { %804 = vsyncadd (%p895_p1), [#allocation6], 4294967040  ;;  %v573_v0 = vld [vmem:[%s215_s19] sm:$0xf]  ;;  %v598_v1 = vld [vmem:[%s215_s19 + $0x4] sm:$0xf0] }
  0x2a   : > { %v564_v2 = vld [vmem:[%s215_s19] sm:$0xf]  ;;  %v574_v3 = vor.u32 %v598_v1, %v573_v0  ;;  %v596_v4 = vld [vmem:[%s215_s19 + $0x4] sm:$0xf0]  ;;  %s838_s1 = smov 119   ;;  %s839_s27 = smov 127  }
  0x2b   : > { %v565_v5 = vor.u32 %v596_v4, %v564_v2  ;;  %v582_v6 = vld [vmem:[%s215_s19] sm:$0xf]  ;;  %v597_v7 = vld [vmem:[%s215_s19 + $0x4] sm:$0xf]  ;;  %v600_v8 = vld [vmem:[%s215_s19 + $0x4] sm:$0xf0] }
  0x2c   : > { %331 = vrot.lane.b32.xlu1 %v574_v3, %s838_s1  ;;  %v575_v9 = vld [vmem:[%s215_s19 + $0x8] sm:$0xf0]  ;;  %v583_v10 = vor.u32 %v600_v8, %v582_v6  ;;  %v559_v11 = vld [vmem:[%s215_s19] sm:$0xf]  ;;  %v594_v12 = vld [vmem:[%s215_s19 + $0x4] sm:$0xf0] }
  0x2d   : > { %293 = vrot.lane.b32.xlu0 %v565_v5, %s839_s27  ;;  %v595_v13 = vld [vmem:[%s215_s19 + $0x4] sm:$0xf]  ;;  %v566_v14 = vld [vmem:[%s215_s19 + $0x8] sm:$0xf0]  ;;  %v560_v15 = vor.u32 %v594_v12, %v559_v11  ;;  %s840_s20 = smov 118   ;;  %vm261_vm0 = vcmask 130048   ;;  %v578_v16 = vor.u32 %v597_v7, %v575_v9 }
  0x2e   : > { %369 = vrot.lane.b32.xlu2 %v583_v10, %s840_s20  ;;  %v599_v17 = vld [vmem:[%s215_s19 + $0x4] sm:$0xf]  ;;  %v584_v18 = vld [vmem:[%s215_s19 + $0x8] sm:$0xf0]  ;;  %v252_v19 = vld [vmem:[#allocation5] sm:$0xf]  ;;  %v569_v20 = vor.u32 %v595_v13, %v566_v14 }
  0x2f   : > { %272 = vmatpush.bf16.msra.mxu0 %v560_v15  ;;  %v587_v21 = vor.u32 %v599_v17, %v584_v18  ;;  %vm373_vm1 = vcmask 965632   ;;  %v358_v25 = vld [vmem:[#allocation5 + $0xc] sm:$0xf]  ;;  %vm335_vm2 = vcmask 973824   ;;  %vm297_vm3 = vcmask 1039360   ;;  %s556_s10 = sshll.u32 %s960_s6, 3 }
  0x30   : > { %v320_v32 = vld [vmem:[#allocation5 + $0x8] sm:$0xf]  ;;  %v282_v33 = vld [vmem:[#allocation5 + $0x4] sm:$0xf]  ;;  %v682_v42 = vld [vmem:[%s1020_s2] ss:$0 sm:$0xff] }
  0x31   : > { %s590_s24 = sshll.u32 %s823_s15, 3  ;;  %s243_s29 = scalar_lea.vmem [#allocation7], %s556_s10 }
  0x32   : > { %561 = vmatmul.msk.bf16.vlgmr.msra.gmra.mxu0 %vm261_vm0, %v252_v19  ;;  %s442_s28 = scalar_lea.hbm %s1021_s3, %s590_s24  ;;  %s444_s21 = sshll.u32 %s243_s29, 4  ;;  %s445_s21 = int_to_ptr.vmem [resolvable:$true] %s444_s21 }
  0x33   : > { %s446_s30 = sshll.u32 %s442_s28, 4  ;;  %s431_s15 = scalar_lea.sflag [#allocation4], %s960_s6  ;;  %s447_s30 = int_to_ptr.hbm [resolvable:$true] %s446_s30 }
  0x34   : > { %333 = vrot.lane.b32.xlu1 %v578_v16, %s838_s1  ;;  %s759_s4 = sshra.s32 %s447_s30, 4  ;;  %s765_s1 = scalar_lea.hbm %s1021_s3, 16  ;;  %s760_s4 = int_to_ptr.hbm [resolvable:$true] %s759_s4 }
  0x35   : > { %295 = vrot.lane.b32.xlu0 %v569_v20, %s839_s27  ;;  %s761_s9 = scalar_lea.hbm %s760_s4, 8  ;;  %p766_p10 = scmp.lt.s32.totalorder %s760_s4, %s1021_s3 }
  0x36   : > { %371 = vrot.lane.b32.xlu2 %v587_v21, %s840_s20  ;;  %p762_p1 = scmp.ne.s32.totalorder %s760_s4, %s761_s9  ;;  %p767_p12 = scmp.lt.s32.totalorder %s765_s1, %s761_s9 }
  0x38   : > { %p763_p4 = pnand %p762_p1, %p940_p5  ;;  %p768_p13 = por %p767_p12, %p766_p10 }
  0x3a   : > { %p764_p8 = pneg %p763_p4 }
  0x3c   : > { %p769_p0 = pnand %p768_p13, %p764_p8 }
  0x88   : > { %v370_v22 = vpop.permute.xlu2 %369 }
  0x90   : > { %v372_v23 = vpop.permute.xlu2 %371 }
  0x91   : > { %v374_v24 = vsel %vm373_vm1, %v370_v22, %v372_v23 }
  0x92   : > { %386 = vmatpush.bf16.msra.mxu3 %v374_v24 }
  0x95   : > { %588 = vmatmul.msk.bf16.vlgmr.msra.gmra.mxu3 %vm261_vm0, %v358_v25 }
  0x9e   : > { %v332_v26 = vpop.permute.xlu1 %331 }
  0x9f   : > { %v294_v27 = vpop.permute.xlu0 %293 }
  0xa6   : > { %v334_v28 = vpop.permute.xlu1 %333 }
  0xa7   : > { %v296_v29 = vpop.permute.xlu0 %295  ;;  %v336_v30 = vsel %vm335_vm2, %v332_v26, %v334_v28 }
  0xa8   : > { %v298_v31 = vsel %vm297_vm3, %v294_v27, %v296_v29  ;;  %348 = vmatpush.bf16.msra.mxu2 %v336_v30 }
  0xa9   : > { %310 = vmatpush.bf16.msra.mxu1 %v298_v31 }
  0xab   : > { %579 = vmatmul.msk.bf16.vlgmr.msra.gmra.mxu2 %vm261_vm0, %v320_v32 }
  0xac   : > { %570 = vmatmul.msk.bf16.vlgmr.msra.gmra.mxu1 %vm261_vm0, %v282_v33 }
  0xaf   : > { %v274_v34 = vpop.f32.mrf.mxu0 }
  0xb7   : > { %v276_v35 = vpop.f32.mrf.mxu0 }
 0x118   : > { %v388_v36 = vpop.f32.mrf.mxu3 }
 0x120   : > { %v390_v37 = vpop.f32.mrf.mxu3 }
 0x129   : > { %v312_v38 = vpop.f32.mrf.mxu1 }
 0x12a   : > { %v316_v39 = vadd.f32 %v312_v38, %v274_v34 }
 0x12e   : > { %v350_v40 = vpop.f32.mrf.mxu2 }
 0x12f   : > { %v354_v41 = vadd.f32 %v350_v40, %v316_v39 }
 0x131   : > { %v314_v43 = vpop.f32.mrf.mxu1  ;;  %v392_v44 = vadd.f32 %v388_v36, %v354_v41 }
 0x133   : > { %v402_v45 = vmul.f32 %v682_v42, %v392_v44 }
 0x135   : > { %403 = vadd.xlane.f32.xlu0 %v402_v45  ;;  %v405_v46 = vmul.f32 %v402_v45, %v392_v44 }
 0x136   : > { %v352_v47 = vpop.f32.mrf.mxu2 }
 0x137   : > { %406 = vadd.xlane.f32.xlu1 %v405_v46 }
 0x1a8   : > { %v404_v48 = vpop.xlane.xlu0 %403 }
 0x1a9   : > { %v408_v49 = vmul.f32 0.015625, %v404_v48 }
 0x1aa   : > { %v407_v50 = vpop.xlane.xlu1 %406 }
 0x1ab   : > { %v410_v51 = vmul.f32 %v408_v49, %v408_v49  ;;  %v409_v52 = vmul.f32 0.015625, %v407_v50  ;;  %v424_v62 = vsub.f32 %v392_v44, %v408_v49 }
 0x1ad   : > { %v411_v53 = vsub.f32 %v409_v52, %v410_v51 }
 0x1af   : > { %v412_v54 = vmax.f32 %v411_v53, 0.0 }
 0x1b1   : > { %v413_v55 = vadd.f32 1e-05, %v412_v54 }
 0x1b3   : > { %683 = vrsqrt.f32 %v413_v55  ;;  %vm420_vm5 = vweird.f32 %v413_v55 }
 0x1b9   : > { %v684_v56 = vpop.eup %683 }
 0x1ba   : > { %v415_v57 = vmul.f32 %v684_v56, %v413_v55  ;;  %vm421_vm4 = vweird.f32 %v684_v56 }
 0x1bb   : > { %vm422_vm6 = vmor %vm420_vm5, %vm421_vm4 }
 0x1bc   : > { %v416_v58 = vmul.f32 %v684_v56, %v415_v57 }
 0x1be   : > { %v417_v59 = vmul.f32 0.5, %v416_v58 }
 0x1c0   : > { %v418_v60 = vsub.f32 1.5, %v417_v59 }
 0x1c2   : > { %v419_v61 = vmul.f32 %v684_v56, %v418_v60 }
 0x1c4   : > { %v423_v63 = vsel %vm422_vm6, %v684_v56, %v419_v61 }
 0x1c5   : > { %v425_v0 = vmul.f32 %v424_v62, %v423_v63 }
 0x1c7   : > { %v427_v1 = vmul.f32 0.2, %v425_v0  ;;  %vm426_vm7 = vcmp.ge.f32.partialorder %v425_v0, 0.0 }
 0x1c9   : > { %v428_v2 = vsel %vm426_vm7, %v425_v0, %v427_v1 }
 0x1ca   : > { %429 = vst [vmem:[%s243_s29] sm:$0xff] %v428_v2 }
 0x1cb   : > { %772 = shalt.err (!%p769_p0)
}
 0x1cc   : > { %607 = dma.vmem_to_hbm [thread:$0]  (%p940_p5), %s445_s21, 128, %s447_s30, %s431_s15  }
 0x1cd PF: > { %s458_s6 = sand.u32 1, %s811_s12   ;;  %p618_p3 = pnand %p549_p11, %p910_p6 }
 0x1ce   : > { %s459_s22 = scalar_lea.sflag [#allocation4], %s458_s6 }
 0x1cf   : > { %p619_p7 = pneg %p618_p3 }
 0x1d1   : > { %806 = dma.done.wait (%p619_p7), %s459_s22, 128  }
 0x1d2   : > { %808 = vsyncadd (%p619_p7), %s459_s22, 4294967168  ;;  %s20_s17 = sadd.s32 1, %s831_s17   ;;  %s1031_s12 = smov %s815_s13 }
 0x1d3   : > { %p17_p9 = scmp.ge.s32.totalorder %s20_s17, 4   ;;  %s1032_s13 = smov %s819_s14 }
 0x1d4   : > { %s1033_s14 = smov %s949_s18  ;;  %s1034_s15 = smov %s827_s16 }
 0x1d5   : > { %s1035_s16 = smov %s1037_s5  ;;  %19 = sbr.rel (!%p17_p9) target bundleno = 9 (0x9), region = 93 }
 0x1da   :  { %465 = vsyncpa [#allocation3], 1 }
 0x1db   :  { %467 = vsyncpa [#allocation3 + $0x1], 1 }
 0x1dc   :  { %468 = vsyncpa [#allocation6], 1 }
 0x1dd   :  { %469 = vsyncpa [#allocation4], 1 }
 0x1de   :  { %471 = vsyncpa [#allocation4 + $0x1], 1 }

// kernel: tpu_custom_call.1
= control target key start
LH: loop header
LB: loop body
LE: loop exit
PB: predicated region body
PF: predicated region fallthrough
CT: control target
= control target key end

     0   :  { %s1018_s0 = inlined_call_operand.hbm [shape: bf16[2,16,256], index: 0, kind: input, shape index: {}]   ;;  %s1019_s1 = inlined_call_operand.hbm [shape: bf16[4,8,16], index: 1, kind: input, shape index: {}]   ;;  %s1020_s2 = inlined_call_operand.vmem [shape: f32[1,128], index: 2, kind: input, shape index: {}]   ;;  %s1021_s3 = inlined_call_operand.hbm [shape: f32[2,8,128], index: 3, kind: output, shape index: {}]  }
   0x1   :  { %1022 = sst [smem:[#allocation11_spill]] %s1019_s1 }
   0x2   :  { %8 = vsyncpa [#allocation3], 0 }
   0x3   :  { %10 = vsyncpa [#allocation3 + $0x1], 0 }
   0x4   :  { %11 = vsyncpa [#allocation6], 0 }
   0x5   :  { %12 = vsyncpa [#allocation4], 0 }
   0x6   :  { %14 = vsyncpa [#allocation4 + $0x1], 0  ;;  %s861_s12 = smov 0   ;;  %s863_s13 = smov 0  }
   0x7   :  { %s865_s14 = smov 0   ;;  %s867_s15 = smov 0  }
   0x8   :  { %s869_s16 = smov 0   ;;  %s871_s17 = smov 0  }
   0x9 LB: > { %s545_s18 = sadd.s32 4294967295, %s831_s17   ;;  %s546_s19 = sadd.s32 4294967294, %s831_s17   ;;  %s831_s17 = sphi %s871_s17, %s20_s17   ;;  %s827_s16 = sphi %s869_s16, %s1035_s16   ;;  %s823_s15 = sphi %s867_s15, %s1034_s15   ;;  %s819_s14 = sphi %s865_s14, %s1033_s14   ;;  %s815_s13 = sphi %s863_s13, %s1032_s13   ;;  %s811_s12 = sphi %s861_s12, %s1031_s12  }
   0xa   : > { %p61_p0 = scmp.ne.s32.totalorder %s815_s13, %s811_s12  ;;  %p895_p1 = scmp.eq.s32.totalorder %s545_s18, 0 }
   0xb   : > { %p899_p2 = scmp.eq.s32.totalorder %s545_s18, 1  ;;  %p142_p3 = scmp.eq.s32.totalorder %s546_s19, 1 }
   0xc   : > { %p905_p4 = por %p895_p1, %p61_p0  ;;  %p547_p5 = scmp.ge.s32.totalorder %s831_s17, 1 }
   0xd   : > { %p910_p6 = por %p142_p3, %p61_p0  ;;  %p149_p7 = scmp.lt.s32.totalorder %s831_s17, 3 }
   0xe   : > { %s1027_s1 = sld [smem:[#allocation11_spill]]  ;;  %s833_s28 = smov [#allocation5]  }
   0xf   : > { %p918_p8 = pnand %p547_p5, %p149_p7  ;;  %s165_s29 = sshll.u32 %s833_s28, 4  ;;  %s166_s29 = int_to_ptr.vmem [resolvable:$true] %s165_s29 }
  0x10   : > { %p549_p11 = scmp.ge.s32.totalorder %s831_s17, 2  ;;  %s834_s30 = smov 64  }
  0x11   : > { %p609_p9 = pneg %p918_p8  ;;  %s835_s4 = smov 4  }
  0x12   : > { %s39_s5 = sadd.s32 1, %s827_s16  ;;  %s48_s6 = sadd.s32 1, %s819_s14 }
  0x13   : > { %p610_p10 = pnand %p609_p9, %p895_p1  ;;  %p41_p12 = scmp.ge.s32.totalorder %s39_s5, 2 }
  0x14   : > { %s163_s26 = sshll.u32 %s1027_s1, 4  ;;  %p55_p13 = scmp.ne.s32.totalorder %s819_s14, %s815_s13  ;;  %s164_s26 = int_to_ptr.hbm [resolvable:$true] %s163_s26 }
  0x15   : > { %612 = dma.hbm_to_vmem [thread:$0]  (!%p610_p10), %s164_s26, 256, %s166_s29, [#allocation6], %s834_s30, %s834_s30, %s835_s4  }
  0x16   : > { %p56_p0 = scmp.eq.s32.totalorder %s831_s17, 0  ;;  %s1037_s5 = smov (%p41_p12, %s39_s5), 0 }
  0x17   : > { %p940_p5 = por %p899_p2, %p55_p13  ;;  %s43_s9 = ssub.s32 %s827_s16, %s1037_s5 }
  0x18   : > { %p934_p3 = por %p56_p0, %p55_p13  ;;  %p622_p7 = scmp.lt.s32.totalorder %s831_s17, 2 }
  0x19   : > { %p46_p9 = scmp.eq.s32.totalorder %s43_s9, 0  ;;  %s182_s10 = sand.u32 1, %s819_s14  }
  0x1a   : > { %s550_s11 = sshll.u32 %s182_s10, 4  ;;  %s593_s19 = sshll.u32 %s827_s16, 4 }
  0x1b   : > { %s949_s18 = scalar_select %p46_p9, %s819_s14, %s48_s6  }
  0x1c   : > { %s194_s26 = scalar_lea.hbm %s1018_s0, %s593_s19  ;;  %s186_s28 = scalar_lea.vmem [#allocation2], %s550_s11 }
  0x1d   : > { %s197_s29 = sshll.u32 %s186_s28, 4  ;;  %s195_s21 = sshll.u32 %s194_s26, 4  ;;  %s198_s29 = int_to_ptr.vmem [resolvable:$true] %s197_s29  ;;  %s196_s21 = int_to_ptr.hbm [resolvable:$true] %s195_s21 }
  0x1e   : > { %p614_p2 = pnand %p622_p7, %p934_p3  ;;  %s183_s30 = scalar_lea.sflag [#allocation3], %s182_s10 }
  0x1f   : > { %s836_s4 = smov 128   ;;  %s837_s1 = smov 8  }
  0x20   : > { %616 = dma.hbm_to_vmem [thread:$0]  (!%p614_p2), %s196_s21, 256, %s198_s29, %s183_s30, %s836_s4, %s836_s4, %s837_s1  }
  0x21   : > { %209 = sbr.rel (%p918_p8) target bundleno = 461 (0x1cd), region = 32  ;;  %s960_s6 = sand.u32 (!%p918_p8), 1, %s815_s13  }
  0x22   : > { %s554_s9 = sshll.u32 (!%p918_p8), %s960_s6, 4  ;;  %s212_s11 = scalar_lea.sflag (!%p918_p8), [#allocation3], %s960_s6 }
  0x23   : > { %s215_s19 = scalar_lea.vmem (!%p918_p8), [#allocation2], %s554_s9 }
  0x26   : > { %798 = dma.done.wait (%p905_p4), %s212_s11, 256  }
  0x27   : > { %800 = vsyncadd (%p905_p4), %s212_s11, 4294967040 }
  0x28   : > { %802 = dma.done.wait (%p895_p1), [#allocation6], 256  }
  0x29   : > { %804 = vsyncadd (%p895_p1), [#allocation6], 4294967040  ;;  %v573_v0 = vld [vmem:[%s215_s19] sm:$0xf]  ;;  %v598_v1 = vld [vmem:[%s215_s19 + $0x4] sm:$0xf0] }
  0x2a   : > { %v564_v2 = vld [vmem:[%s215_s19] sm:$0xf]  ;;  %v574_v3 = vor.u32 %v598_v1, %v573_v0  ;;  %v596_v4 = vld [vmem:[%s215_s19 + $0x4] sm:$0xf0]  ;;  %s838_s1 = smov 119   ;;  %s839_s27 = smov 127  }
  0x2b   : > { %v565_v5 = vor.u32 %v596_v4, %v564_v2  ;;  %v582_v6 = vld [vmem:[%s215_s19] sm:$0xf]  ;;  %v597_v7 = vld [vmem:[%s215_s19 + $0x4] sm:$0xf]  ;;  %v600_v8 = vld [vmem:[%s215_s19 + $0x4] sm:$0xf0] }
  0x2c   : > { %331 = vrot.lane.b32.xlu1 %v574_v3, %s838_s1  ;;  %v575_v9 = vld [vmem:[%s215_s19 + $0x8] sm:$0xf0]  ;;  %v583_v10 = vor.u32 %v600_v8, %v582_v6  ;;  %v559_v11 = vld [vmem:[%s215_s19] sm:$0xf]  ;;  %v594_v12 = vld [vmem:[%s215_s19 + $0x4] sm:$0xf0] }
  0x2d   : > { %293 = vrot.lane.b32.xlu0 %v565_v5, %s839_s27  ;;  %v595_v13 = vld [vmem:[%s215_s19 + $0x4] sm:$0xf]  ;;  %v566_v14 = vld [vmem:[%s215_s19 + $0x8] sm:$0xf0]  ;;  %v560_v15 = vor.u32 %v594_v12, %v559_v11  ;;  %s840_s20 = smov 118   ;;  %vm261_vm0 = vcmask 130048   ;;  %v578_v16 = vor.u32 %v597_v7, %v575_v9 }
  0x2e   : > { %369 = vrot.lane.b32.xlu2 %v583_v10, %s840_s20  ;;  %v599_v17 = vld [vmem:[%s215_s19 + $0x4] sm:$0xf]  ;;  %v584_v18 = vld [vmem:[%s215_s19 + $0x8] sm:$0xf0]  ;;  %v252_v19 = vld [vmem:[#allocation5] sm:$0xf]  ;;  %v569_v20 = vor.u32 %v595_v13, %v566_v14 }
  0x2f   : > { %272 = vmatpush.bf16.msra.mxu0 %v560_v15  ;;  %v587_v21 = vor.u32 %v599_v17, %v584_v18  ;;  %vm373_vm1 = vcmask 965632   ;;  %v358_v25 = vld [vmem:[#allocation5 + $0xc] sm:$0xf]  ;;  %vm335_vm2 = vcmask 973824   ;;  %vm297_vm3 = vcmask 1039360   ;;  %s556_s10 = sshll.u32 %s960_s6, 3 }
  0x30   : > { %v320_v32 = vld [vmem:[#allocation5 + $0x8] sm:$0xf]  ;;  %v282_v33 = vld [vmem:[#allocation5 + $0x4] sm:$0xf]  ;;  %v682_v42 = vld [vmem:[%s1020_s2] ss:$0 sm:$0xff] }
  0x31   : > { %s590_s24 = sshll.u32 %s823_s15, 3  ;;  %s243_s29 = scalar_lea.vmem [#allocation7], %s556_s10 }
  0x32   : > { %561 = vmatmul.msk.bf16.vlgmr.msra.gmra.mxu0 %vm261_vm0, %v252_v19  ;;  %s442_s28 = scalar_lea.hbm %s1021_s3, %s590_s24  ;;  %s444_s21 = sshll.u32 %s243_s29, 4  ;;  %s445_s21 = int_to_ptr.vmem [resolvable:$true] %s444_s21 }
  0x33   : > { %s446_s30 = sshll.u32 %s442_s28, 4  ;;  %s431_s15 = scalar_lea.sflag [#allocation4], %s960_s6  ;;  %s447_s30 = int_to_ptr.hbm [resolvable:$true] %s446_s30 }
  0x34   : > { %333 = vrot.lane.b32.xlu1 %v578_v16, %s838_s1  ;;  %s759_s4 = sshra.s32 %s447_s30, 4  ;;  %s765_s1 = scalar_lea.hbm %s1021_s3, 16  ;;  %s760_s4 = int_to_ptr.hbm [resolvable:$true] %s759_s4 }
  0x35   : > { %295 = vrot.lane.b32.xlu0 %v569_v20, %s839_s27  ;;  %s761_s9 = scalar_lea.hbm %s760_s4, 8  ;;  %p766_p10 = scmp.lt.s32.totalorder %s760_s4, %s1021_s3 }
  0x36   : > { %371 = vrot.lane.b32.xlu2 %v587_v21, %s840_s20  ;;  %p762_p1 = scmp.ne.s32.totalorder %s760_s4, %s761_s9  ;;  %p767_p12 = scmp.lt.s32.totalorder %s765_s1, %s761_s9 }
  0x38   : > { %p763_p4 = pnand %p762_p1, %p940_p5  ;;  %p768_p13 = por %p767_p12, %p766_p10 }
  0x3a   : > { %p764_p8 = pneg %p763_p4 }
  0x3c   : > { %p769_p0 = pnand %p768_p13, %p764_p8 }
  0x88   : > { %v370_v22 = vpop.permute.xlu2 %369 }
  0x90   : > { %v372_v23 = vpop.permute.xlu2 %371 }
  0x91   : > { %v374_v24 = vsel %vm373_vm1, %v370_v22, %v372_v23 }
  0x92   : > { %386 = vmatpush.bf16.msra.mxu3 %v374_v24 }
  0x95   : > { %588 = vmatmul.msk.bf16.vlgmr.msra.gmra.mxu3 %vm261_vm0, %v358_v25 }
  0x9e   : > { %v332_v26 = vpop.permute.xlu1 %331 }
  0x9f   : > { %v294_v27 = vpop.permute.xlu0 %293 }
  0xa6   : > { %v334_v28 = vpop.permute.xlu1 %333 }
  0xa7   : > { %v296_v29 = vpop.permute.xlu0 %295  ;;  %v336_v30 = vsel %vm335_vm2, %v332_v26, %v334_v28 }
  0xa8   : > { %v298_v31 = vsel %vm297_vm3, %v294_v27, %v296_v29  ;;  %348 = vmatpush.bf16.msra.mxu2 %v336_v30 }
  0xa9   : > { %310 = vmatpush.bf16.msra.mxu1 %v298_v31 }
  0xab   : > { %579 = vmatmul.msk.bf16.vlgmr.msra.gmra.mxu2 %vm261_vm0, %v320_v32 }
  0xac   : > { %570 = vmatmul.msk.bf16.vlgmr.msra.gmra.mxu1 %vm261_vm0, %v282_v33 }
  0xaf   : > { %v274_v34 = vpop.f32.mrf.mxu0 }
  0xb7   : > { %v276_v35 = vpop.f32.mrf.mxu0 }
 0x118   : > { %v388_v36 = vpop.f32.mrf.mxu3 }
 0x120   : > { %v390_v37 = vpop.f32.mrf.mxu3 }
 0x129   : > { %v312_v38 = vpop.f32.mrf.mxu1 }
 0x12a   : > { %v316_v39 = vadd.f32 %v312_v38, %v274_v34 }
 0x12e   : > { %v350_v40 = vpop.f32.mrf.mxu2 }
 0x12f   : > { %v354_v41 = vadd.f32 %v350_v40, %v316_v39 }
 0x131   : > { %v314_v43 = vpop.f32.mrf.mxu1  ;;  %v392_v44 = vadd.f32 %v388_v36, %v354_v41 }
 0x133   : > { %v402_v45 = vmul.f32 %v682_v42, %v392_v44 }
 0x135   : > { %403 = vadd.xlane.f32.xlu0 %v402_v45  ;;  %v405_v46 = vmul.f32 %v402_v45, %v392_v44 }
 0x136   : > { %v352_v47 = vpop.f32.mrf.mxu2 }
 0x137   : > { %406 = vadd.xlane.f32.xlu1 %v405_v46 }
 0x1a8   : > { %v404_v48 = vpop.xlane.xlu0 %403 }
 0x1a9   : > { %v408_v49 = vmul.f32 0.015625, %v404_v48 }
 0x1aa   : > { %v407_v50 = vpop.xlane.xlu1 %406 }
 0x1ab   : > { %v410_v51 = vmul.f32 %v408_v49, %v408_v49  ;;  %v409_v52 = vmul.f32 0.015625, %v407_v50  ;;  %v424_v62 = vsub.f32 %v392_v44, %v408_v49 }
 0x1ad   : > { %v411_v53 = vsub.f32 %v409_v52, %v410_v51 }
 0x1af   : > { %v412_v54 = vmax.f32 %v411_v53, 0.0 }
 0x1b1   : > { %v413_v55 = vadd.f32 1e-05, %v412_v54 }
 0x1b3   : > { %683 = vrsqrt.f32 %v413_v55  ;;  %vm420_vm5 = vweird.f32 %v413_v55 }
 0x1b9   : > { %v684_v56 = vpop.eup %683 }
 0x1ba   : > { %v415_v57 = vmul.f32 %v684_v56, %v413_v55  ;;  %vm421_vm4 = vweird.f32 %v684_v56 }
 0x1bb   : > { %vm422_vm6 = vmor %vm420_vm5, %vm421_vm4 }
 0x1bc   : > { %v416_v58 = vmul.f32 %v684_v56, %v415_v57 }
 0x1be   : > { %v417_v59 = vmul.f32 0.5, %v416_v58 }
 0x1c0   : > { %v418_v60 = vsub.f32 1.5, %v417_v59 }
 0x1c2   : > { %v419_v61 = vmul.f32 %v684_v56, %v418_v60 }
 0x1c4   : > { %v423_v63 = vsel %vm422_vm6, %v684_v56, %v419_v61 }
 0x1c5   : > { %v425_v0 = vmul.f32 %v424_v62, %v423_v63 }
 0x1c7   : > { %v427_v1 = vmul.f32 0.2, %v425_v0  ;;  %vm426_vm7 = vcmp.ge.f32.partialorder %v425_v0, 0.0 }
 0x1c9   : > { %v428_v2 = vsel %vm426_vm7, %v425_v0, %v427_v1 }
 0x1ca   : > { %429 = vst [vmem:[%s243_s29] sm:$0xff] %v428_v2 }
 0x1cb   : > { %772 = shalt.err (!%p769_p0)
}
 0x1cc   : > { %607 = dma.vmem_to_hbm [thread:$0]  (%p940_p5), %s445_s21, 128, %s447_s30, %s431_s15  }
 0x1cd PF: > { %s458_s6 = sand.u32 1, %s811_s12   ;;  %p618_p3 = pnand %p549_p11, %p910_p6 }
 0x1ce   : > { %s459_s22 = scalar_lea.sflag [#allocation4], %s458_s6 }
 0x1cf   : > { %p619_p7 = pneg %p618_p3 }
 0x1d1   : > { %806 = dma.done.wait (%p619_p7), %s459_s22, 128  }
 0x1d2   : > { %808 = vsyncadd (%p619_p7), %s459_s22, 4294967168  ;;  %s20_s17 = sadd.s32 1, %s831_s17   ;;  %s1031_s12 = smov %s815_s13 }
 0x1d3   : > { %p17_p9 = scmp.ge.s32.totalorder %s20_s17, 4   ;;  %s1032_s13 = smov %s819_s14 }
 0x1d4   : > { %s1033_s14 = smov %s949_s18  ;;  %s1034_s15 = smov %s827_s16 }
 0x1d5   : > { %s1035_s16 = smov %s1037_s5  ;;  %19 = sbr.rel (!%p17_p9) target bundleno = 9 (0x9), region = 93 }
 0x1da   :  { %465 = vsyncpa [#allocation3], 1 }
 0x1db   :  { %467 = vsyncpa [#allocation3 + $0x1], 1 }
 0x1dc   :  { %468 = vsyncpa [#allocation6], 1 }
 0x1dd   :  { %469 = vsyncpa [#allocation4], 1 }
 0x1de   :  { %471 = vsyncpa [#allocation4 + $0x1], 1 }

</bundles_post_ra>
